<compile_context>
chip_gen: v6e
topology: v6e:2x2x1
jax: 0.10.0
libtpu: 0.0.40
codegen_flags: <defaults>
</compile_context>

<pallas_src>
import functools

import jax
import jax.numpy as jnp
from jax import lax
from jax.experimental import pallas as pl
from jax.experimental.pallas import tpu as pltpu

PAD = 128      # hidden width / packed lane width
ALIGN = 16     # row alignment of packed weight blocks (bf16 tile = (16, 128))


def _round_up(x, m):
    return (x + m - 1) // m * m


def _is_dual_core():
    """True on chips with 2 TensorCores (v4 / v5p / v7x); best-effort check."""
    try:
        kind = jax.devices()[0].device_kind.lower()
    except Exception:
        return True
    return any(t in kind for t in ("v7", "v4", "v5p"))


# --------------------------------------------------------------------------
# Parameter init (nn.Linear-like) and one-time packing
# --------------------------------------------------------------------------
def init_params(key, state_dim, action_dim, embedding_dim):
    """Uniform(+/- 1/sqrt(fan_in)) like nn.Linear defaults; weights stored (in, out)."""
    dims = [state_dim + action_dim, 128, 128, 128, 32, 32, embedding_dim]
    params = []
    for i in range(len(dims) - 1):
        fan_in, fan_out = dims[i], dims[i + 1]
        key, kw, kb = jax.random.split(key, 3)
        bound = 1.0 / jnp.sqrt(jnp.float32(fan_in))
        w = jax.random.uniform(kw, (fan_in, fan_out), jnp.float32, -bound, bound)
        b = jax.random.uniform(kb, (fan_out,), jnp.float32, -bound, bound)
        params.append((w, b))
    return params


def pack_params(params, state_dim, action_dim, embedding_dim):
    """One-time packing: weights -> single (R,128) bf16 slab, biases -> (8,128) f32."""
    (w1, b1), (w2, b2), (w3, b3), (w4, b4), (w5, b5), (w6, b6) = params
    S, A, E = state_dim, action_dim, embedding_dim
    rS, rA = _round_up(S, ALIGN), _round_up(A, ALIGN)

    def pad_w(w, rows):
        r, c = w.shape
        return jnp.pad(w.astype(jnp.float32), ((0, rows - r), (0, PAD - c)))

    # Layer-1 weight laid out to match the packed input [state | 0.. | action | 0..].
    w1_packed = jnp.concatenate([pad_w(w1[:S], rS), pad_w(w1[S:], rA)], axis=0)

    blocks = [
        w1_packed,       # (rS+rA, 128)
        pad_w(w2, 128),  # (128, 128)
        pad_w(w3, 128),  # (128, 128)
        pad_w(w4, 128),  # (128, 32)  -> cols zero-padded to 128
        pad_w(w5, 32),   # (32, 32)   -> K stays 32 (no zero-K matmul work)
        pad_w(w6, 32),   # (32, E)    -> K stays 32
    ]
    offs, off = [], 0
    for blk in blocks:
        assert off % ALIGN == 0 and blk.shape[0] % ALIGN == 0
        offs.append(off)
        off += blk.shape[0]
    w_slab = jnp.concatenate(blocks, axis=0).astype(jnp.bfloat16)   # (R, 128)

    def pad_b(b):
        return jnp.pad(b.astype(jnp.float32), (0, PAD - b.shape[0]))

    zeros = jnp.zeros((PAD,), jnp.float32)
    b_slab = jnp.stack(
        [pad_b(b1), pad_b(b2), pad_b(b3), pad_b(b4), pad_b(b5), pad_b(b6),
         zeros, zeros], axis=0)                                      # (8, 128)

    return {"w": w_slab, "b": b_slab, "offs": tuple(offs),
            "dims": (S, A, E), "in_pad": (rS, rA)}


# --------------------------------------------------------------------------
# Kernel: full MLP + softmax for one batch tile
# --------------------------------------------------------------------------
def _aux_mlp_kernel(x_ref, w_ref, b_ref, o_ref, *, offs, k_in, E):
    o1, o2, o3, o4, o5, o6 = offs
    bias = b_ref[...]                                        # (8, 128) f32

    def mm(h, off, k):
        # bf16 matmul operands, f32 accumulation on the MXU; static weight slice.
        w = w_ref[off:off + k, :]                            # (k, 128) bf16
        return jnp.dot(h.astype(jnp.bfloat16), w,
                       preferred_element_type=jnp.float32)

    # Layer 1 (fused concat: input already laid out to match the weight slab).
    h = jnp.maximum(mm(x_ref[...], o1, k_in) + bias[0:1, :], 0.0)   # (TB, 128)
    h = jnp.maximum(mm(h, o2, 128) + bias[1:2, :], 0.0)             # (TB, 128)
    h = jnp.maximum(mm(h, o3, 128) + bias[2:3, :], 0.0)             # (TB, 128)
    h = jnp.maximum(mm(h, o4, 128) + bias[3:4, :], 0.0)             # cols 32.. are 0
    h = jnp.maximum(mm(h[:, :32], o5, 32) + bias[4:5, :], 0.0)      # K=32, cols 32.. are 0
    logits = mm(h[:, :32], o6, 32) + bias[5:6, :]                   # (TB, 128); lanes >=E are 0

    # Lane-dense softmax: mask padded lanes, normalize over the 128-wide tile.
    lane = lax.broadcasted_iota(jnp.int32, (1, PAD), 1)
    logits = jnp.where(lane < E, logits, jnp.float32(-1e30))
    m = jnp.max(logits, axis=-1, keepdims=True)
    e = jnp.exp(logits - m)
    inv = pl.reciprocal(jnp.sum(e, axis=-1, keepdims=True), approx=False)
    o_ref[...] = e * inv                                             # (TB, 128) f32


# --------------------------------------------------------------------------
# Wrapper
# --------------------------------------------------------------------------
def aux_distribution_predictor(state, action, packed, *, tile_b=None):
    """state: (B,S) or (S,); action: (B,A) or (A,) -> per-sample softmax probs (B,E) or (E,)."""
    S, A, E = packed["dims"]
    rS, rA = packed["in_pad"]
    k_in = rS + rA

    state = jnp.asarray(state, jnp.float32)
    action = jnp.asarray(action, jnp.float32)
    squeeze = state.ndim == 1
    if squeeze:
        state, action = state[None, :], action[None, :]
    B = state.shape[0]

    # Slab-aligned fused input: [state | 0.. | action | 0..]  -> (B, rS+rA).
    x = jnp.concatenate([jnp.pad(state, ((0, 0), (0, rS - S))),
                         jnp.pad(action, ((0, 0), (0, rA - A)))], axis=-1)

    # Batch tiling: big tiles (amortize per-step overhead); keep >= 2 parallel
    # steps on dual-TensorCore chips so the 2nd core isn't idle.
    if tile_b is None:
        tb = min(_round_up(B, ALIGN), 1024)
        if _is_dual_core() and B >= 2 * ALIGN:
            tb = min(tb, _round_up(pl.cdiv(B, 2), ALIGN))
    else:
        tb = max(ALIGN, _round_up(min(tile_b, B), ALIGN))
    Bp = _round_up(B, tb)
    if Bp != B:
        x = jnp.pad(x, ((0, Bp - B), (0, 0)))

    kernel = functools.partial(_aux_mlp_kernel,
                               offs=packed["offs"], k_in=k_in, E=E)

    out = pl.pallas_call(
        kernel,
        out_shape=jax.ShapeDtypeStruct((Bp, PAD), jnp.float32),      # lane-dense output
        grid_spec=pltpu.PrefetchScalarGridSpec(
            num_scalar_prefetch=0,
            grid=(Bp // tb,),
            in_specs=[
                pl.BlockSpec((tb, k_in), lambda i: (i, 0)),
                pl.BlockSpec(packed["w"].shape, lambda i: (0, 0)),   # resident weights
                pl.BlockSpec(packed["b"].shape, lambda i: (0, 0)),   # resident biases
            ],
            out_specs=pl.BlockSpec((tb, PAD), lambda i: (i, 0)),
        ),
        compiler_params=pltpu.CompilerParams(
            dimension_semantics=("parallel",)),
    )(x, packed["w"], packed["b"])

    out = out[:B, :E]
    return out[0] if squeeze else out


# --------------------------------------------------------------------------
# Pure-JAX f32 reference (for tolerance check)
# --------------------------------------------------------------------------
def _reference(state, action, params):
    x = jnp.concatenate([state, action], axis=-1)
    for i, (w, b) in enumerate(params):
        x = x @ w + b
        if i < len(params) - 1:
            x = jnp.maximum(x, 0.0)
    return jax.nn.softmax(x, axis=-1)


if __name__ == "__main__":
    state_dim, action_dim, embedding_dim = 12, 4, 8
    B = 64

    key = jax.random.PRNGKey(0)
    k_params, k_state, k_action = jax.random.split(key, 3)

    params = init_params(k_params, state_dim, action_dim, embedding_dim)
    packed = pack_params(params, state_dim, action_dim, embedding_dim)   # one-time

    state = jax.random.normal(k_state, (B, state_dim), jnp.float32)
    action = jax.random.normal(k_action, (B, action_dim), jnp.float32)

    ref = _reference(state, action, params)

    # Batched call with auto tile sizing.
    probs = aux_distribution_predictor(state, action, packed)
    probs = jax.block_until_ready(probs)
    assert probs.shape == (B, embedding_dim)
    assert bool(jnp.all(jnp.isfinite(probs)))
    assert bool(jnp.all(jnp.abs(jnp.sum(probs, axis=-1) - 1.0) < 1e-3))
    assert bool(jnp.all(jnp.abs(probs - ref) < 2e-2)), "mismatch vs f32 reference"

    # Explicit tile size -> multi-step grid (exercises batch tiling path).
    probs2 = aux_distribution_predictor(state, action, packed, tile_b=32)
    probs2 = jax.block_until_ready(probs2)
    assert probs2.shape == (B, embedding_dim)
    assert bool(jnp.all(jnp.abs(probs2 - ref) < 2e-2))

    # Single-sample call (original PyTorch 1-D API).
    p1 = aux_distribution_predictor(state[0], action[0], packed)
    p1 = jax.block_until_ready(p1)
    assert p1.shape == (embedding_dim,)
    assert bool(jnp.abs(jnp.sum(p1) - 1.0) < 1e-3)
    assert bool(jnp.all(jnp.abs(p1 - ref[0]) < 2e-2))

    print("KERNEL_OK")
</pallas_src>

<mosaic_0001>
module attributes {stable_mosaic.version = 11 : i64} {
  func.func @_aux_mlp_kernel(%arg0: i32, %arg1: memref<64x32xf32, #tpu.memory_space<vmem>>, %arg2: memref<480x128xbf16, #tpu.memory_space<vmem>>, %arg3: memref<8x128xf32, #tpu.memory_space<vmem>>, %arg4: memref<64x128xf32, #tpu.memory_space<vmem>>) attributes {dimension_semantics = [#tpu.dimension_semantics<parallel>], iteration_bounds = array<i64: 1>, scalar_prefetch = 0 : i64, scratch_operands = 0 : i64, tpu.core_type = #tpu.core_type<tc>, window_params = [{transform_indices = @transform_0, window_bounds = array<i64: 64, 32>}, {pipeline_mode = #tpu.pipeline_mode<synchronous>, transform_indices = @transform_1, window_bounds = array<i64: 480, 128>}, {pipeline_mode = #tpu.pipeline_mode<synchronous>, transform_indices = @transform_2, window_bounds = array<i64: 8, 128>}, {transform_indices = @transform_3, window_bounds = array<i64: 64, 128>}]} {
    %c0 = arith.constant 0 : index
    %c0_0 = arith.constant 0 : index
    %0 = vector.load %arg3[%c0, %c0_0] : memref<8x128xf32, #tpu.memory_space<vmem>>, vector<8x128xf32>
    %c0_1 = arith.constant 0 : index
    %c0_2 = arith.constant 0 : index
    %1 = vector.load %arg1[%c0_1, %c0_2] : memref<64x32xf32, #tpu.memory_space<vmem>>, vector<64x32xf32>
    %c0_3 = arith.constant 0 : index
    %c0_4 = arith.constant 0 : index
    %2 = vector.load %arg2[%c0_3, %c0_4] : memref<480x128xbf16, #tpu.memory_space<vmem>>, vector<32x128xbf16>
    %3 = arith.truncf %1 : vector<64x32xf32> to vector<64x32xbf16>
    %cst = arith.constant dense<0.000000e+00> : vector<64x128xf32>
    %4 = tpu.matmul %3, %2, %cst {dimension_numbers = #tpu.dot_dimension_numbers<[1], [0], [0], [1], [0, 0, 1, 1], [], []>} : vector<64x32xbf16>, vector<32x128xbf16>, vector<64x128xf32> -> vector<64x128xf32>
    %5 = vector.extract_strided_slice %0 {offsets = [0, 0], sizes = [1, 128], strides = [1, 1]} : vector<8x128xf32> to vector<1x128xf32>
    %6 = vector.broadcast %5 : vector<1x128xf32> to vector<64x128xf32>
    %7 = arith.addf %4, %6 : vector<64x128xf32>
    %cst_5 = arith.constant 0.000000e+00 : f32
    %8 = vector.broadcast %cst_5 : f32 to vector<64x128xf32>
    %9 = arith.maximumf %7, %8 : vector<64x128xf32>
    %c32 = arith.constant 32 : index
    %c0_6 = arith.constant 0 : index
    %10 = vector.load %arg2[%c32, %c0_6] : memref<480x128xbf16, #tpu.memory_space<vmem>>, vector<128x128xbf16>
    %11 = arith.truncf %9 : vector<64x128xf32> to vector<64x128xbf16>
    %cst_7 = arith.constant dense<0.000000e+00> : vector<64x128xf32>
    %12 = tpu.matmul %11, %10, %cst_7 {dimension_numbers = #tpu.dot_dimension_numbers<[1], [0], [0], [1], [0, 0, 1, 1], [], []>} : vector<64x128xbf16>, vector<128x128xbf16>, vector<64x128xf32> -> vector<64x128xf32>
    %13 = vector.extract_strided_slice %0 {offsets = [1, 0], sizes = [1, 128], strides = [1, 1]} : vector<8x128xf32> to vector<1x128xf32>
    %14 = vector.broadcast %13 : vector<1x128xf32> to vector<64x128xf32>
    %15 = arith.addf %12, %14 : vector<64x128xf32>
    %cst_8 = arith.constant 0.000000e+00 : f32
    %16 = vector.broadcast %cst_8 : f32 to vector<64x128xf32>
    %17 = arith.maximumf %15, %16 : vector<64x128xf32>
    %c160 = arith.constant 160 : index
    %c0_9 = arith.constant 0 : index
    %18 = vector.load %arg2[%c160, %c0_9] : memref<480x128xbf16, #tpu.memory_space<vmem>>, vector<128x128xbf16>
    %19 = arith.truncf %17 : vector<64x128xf32> to vector<64x128xbf16>
    %cst_10 = arith.constant dense<0.000000e+00> : vector<64x128xf32>
    %20 = tpu.matmul %19, %18, %cst_10 {dimension_numbers = #tpu.dot_dimension_numbers<[1], [0], [0], [1], [0, 0, 1, 1], [], []>} : vector<64x128xbf16>, vector<128x128xbf16>, vector<64x128xf32> -> vector<64x128xf32>
    %21 = vector.extract_strided_slice %0 {offsets = [2, 0], sizes = [1, 128], strides = [1, 1]} : vector<8x128xf32> to vector<1x128xf32>
    %22 = vector.broadcast %21 : vector<1x128xf32> to vector<64x128xf32>
    %23 = arith.addf %20, %22 : vector<64x128xf32>
    %cst_11 = arith.constant 0.000000e+00 : f32
    %24 = vector.broadcast %cst_11 : f32 to vector<64x128xf32>
    %25 = arith.maximumf %23, %24 : vector<64x128xf32>
    %c288 = arith.constant 288 : index
    %c0_12 = arith.constant 0 : index
    %26 = vector.load %arg2[%c288, %c0_12] : memref<480x128xbf16, #tpu.memory_space<vmem>>, vector<128x128xbf16>
    %27 = arith.truncf %25 : vector<64x128xf32> to vector<64x128xbf16>
    %cst_13 = arith.constant dense<0.000000e+00> : vector<64x128xf32>
    %28 = tpu.matmul %27, %26, %cst_13 {dimension_numbers = #tpu.dot_dimension_numbers<[1], [0], [0], [1], [0, 0, 1, 1], [], []>} : vector<64x128xbf16>, vector<128x128xbf16>, vector<64x128xf32> -> vector<64x128xf32>
    %29 = vector.extract_strided_slice %0 {offsets = [3, 0], sizes = [1, 128], strides = [1, 1]} : vector<8x128xf32> to vector<1x128xf32>
    %30 = vector.broadcast %29 : vector<1x128xf32> to vector<64x128xf32>
    %31 = arith.addf %28, %30 : vector<64x128xf32>
    %cst_14 = arith.constant 0.000000e+00 : f32
    %32 = vector.broadcast %cst_14 : f32 to vector<64x128xf32>
    %33 = arith.maximumf %31, %32 : vector<64x128xf32>
    %34 = vector.extract_strided_slice %33 {offsets = [0, 0], sizes = [64, 32], strides = [1, 1]} : vector<64x128xf32> to vector<64x32xf32>
    %c416 = arith.constant 416 : index
    %c0_15 = arith.constant 0 : index
    %35 = vector.load %arg2[%c416, %c0_15] : memref<480x128xbf16, #tpu.memory_space<vmem>>, vector<32x128xbf16>
    %36 = arith.truncf %34 : vector<64x32xf32> to vector<64x32xbf16>
    %cst_16 = arith.constant dense<0.000000e+00> : vector<64x128xf32>
    %37 = tpu.matmul %36, %35, %cst_16 {dimension_numbers = #tpu.dot_dimension_numbers<[1], [0], [0], [1], [0, 0, 1, 1], [], []>} : vector<64x32xbf16>, vector<32x128xbf16>, vector<64x128xf32> -> vector<64x128xf32>
    %38 = vector.extract_strided_slice %0 {offsets = [4, 0], sizes = [1, 128], strides = [1, 1]} : vector<8x128xf32> to vector<1x128xf32>
    %39 = vector.broadcast %38 : vector<1x128xf32> to vector<64x128xf32>
    %40 = arith.addf %37, %39 : vector<64x128xf32>
    %cst_17 = arith.constant 0.000000e+00 : f32
    %41 = vector.broadcast %cst_17 : f32 to vector<64x128xf32>
    %42 = arith.maximumf %40, %41 : vector<64x128xf32>
    %43 = vector.extract_strided_slice %42 {offsets = [0, 0], sizes = [64, 32], strides = [1, 1]} : vector<64x128xf32> to vector<64x32xf32>
    %c448 = arith.constant 448 : index
    %c0_18 = arith.constant 0 : index
    %44 = vector.load %arg2[%c448, %c0_18] : memref<480x128xbf16, #tpu.memory_space<vmem>>, vector<32x128xbf16>
    %45 = arith.truncf %43 : vector<64x32xf32> to vector<64x32xbf16>
    %cst_19 = arith.constant dense<0.000000e+00> : vector<64x128xf32>
    %46 = tpu.matmul %45, %44, %cst_19 {dimension_numbers = #tpu.dot_dimension_numbers<[1], [0], [0], [1], [0, 0, 1, 1], [], []>} : vector<64x32xbf16>, vector<32x128xbf16>, vector<64x128xf32> -> vector<64x128xf32>
    %47 = vector.extract_strided_slice %0 {offsets = [5, 0], sizes = [1, 128], strides = [1, 1]} : vector<8x128xf32> to vector<1x128xf32>
    %48 = vector.broadcast %47 : vector<1x128xf32> to vector<64x128xf32>
    %49 = arith.addf %46, %48 : vector<64x128xf32>
    %50 = tpu.iota {dimensions = array<i32: 1>} : vector<1x128xi32>
    %c8_i32 = arith.constant 8 : i32
    %51 = vector.broadcast %c8_i32 : i32 to vector<1x128xi32>
    %52 = arith.cmpi slt, %50, %51 : vector<1x128xi32>
    %cst_20 = arith.constant -1.000000e+30 : f32
    %53 = vector.shape_cast %52 : vector<1x128xi1> to vector<1x128xi1>
    %54 = vector.broadcast %53 : vector<1x128xi1> to vector<64x128xi1>
    %55 = vector.broadcast %cst_20 : f32 to vector<64x128xf32>
    %56 = arith.select %54, %49, %55 : vector<64x128xi1>, vector<64x128xf32>
    %cst_21 = arith.constant dense<0xFF800000> : vector<64xf32>
    %57 = vector.multi_reduction <maximumf>, %56, %cst_21 [1] : vector<64x128xf32> to vector<64xf32>
    %58 = vector.shape_cast %57 : vector<64xf32> to vector<64x1xf32>
    %59 = vector.broadcast %58 : vector<64x1xf32> to vector<64x128xf32>
    %60 = arith.subf %56, %59 : vector<64x128xf32>
    %61 = math.exp %60 : vector<64x128xf32>
    %cst_22 = arith.constant dense<0.000000e+00> : vector<64xf32>
    %62 = vector.multi_reduction <add>, %61, %cst_22 [1] : vector<64x128xf32> to vector<64xf32>
    %63 = vector.shape_cast %62 : vector<64xf32> to vector<64x1xf32>
    %64 = tpu.reciprocal %63 : vector<64x1xf32> -> vector<64x1xf32>
    %65 = vector.broadcast %64 : vector<64x1xf32> to vector<64x128xf32>
    %66 = arith.mulf %61, %65 : vector<64x128xf32>
    %c0_23 = arith.constant 0 : index
    %c0_24 = arith.constant 0 : index
    %67 = vector.load %arg4[%c0_23, %c0_24] : memref<64x128xf32, #tpu.memory_space<vmem>>, vector<64x128xf32>
    tpu.vector_store %arg4[%c0_23, %c0_24], %66 {strides = array<i32>} : memref<64x128xf32, #tpu.memory_space<vmem>>, vector<64x128xf32>,
    return
  }
  func.func @transform_0(%arg0: i32) -> (i32, i32) {
    %c0_i32 = arith.constant 0 : i32
    %c0_i32_0 = arith.constant 0 : i32
    return %arg0, %c0_i32 : i32, i32
  }
  func.func @transform_1(%arg0: i32) -> (i32, i32) {
    %c0_i32 = arith.constant 0 : i32
    %c0_i32_0 = arith.constant 0 : i32
    %c0_i32_1 = arith.constant 0 : i32
    return %c0_i32, %c0_i32_0 : i32, i32
  }
  func.func @transform_2(%arg0: i32) -> (i32, i32) {
    %c0_i32 = arith.constant 0 : i32
    %c0_i32_0 = arith.constant 0 : i32
    %c0_i32_1 = arith.constant 0 : i32
    return %c0_i32, %c0_i32_0 : i32, i32
  }
  func.func @transform_3(%arg0: i32) -> (i32, i32) {
    %c0_i32 = arith.constant 0 : i32
    %c0_i32_0 = arith.constant 0 : i32
    return %arg0, %c0_i32 : i32, i32
  }
}

</mosaic_0001>

<bundles_post_ra>
// kernel: tpu_custom_call.1
= control target key start
LH: loop header
LB: loop body
LE: loop exit
PB: predicated region body
PF: predicated region fallthrough
CT: control target
= control target key end

     0   :  { %8 = vsyncpa [#allocation3], 0  ;;  %s1317_s0 = inlined_call_operand.vmem [shape: f32[64,32], index: 0, kind: input, shape index: {}]   ;;  %s1318_s1 = inlined_call_operand.hbm [shape: bf16[480,128], index: 1, kind: input, shape index: {}]   ;;  %s1319_s2 = inlined_call_operand.vmem [shape: f32[8,128], index: 2, kind: input, shape index: {}]   ;;  %s1320_s3 = inlined_call_operand.hbm [shape: f32[64,128], index: 3, kind: output, shape index: {}]  }
   0x1   :  { %9 = vsyncpa [#allocation4], 0  ;;  %s1220_s12 = smov [#allocation2]  }
   0x2   :  { %s17_s13 = sshll.u32 %s1220_s12, 4  ;;  %s18_s13 = int_to_ptr.vmem [resolvable:$true] %s17_s13 }
   0x3   :  { %s1184_s14 = scalar_lea.vmem %s18_s13, 3840  ;;  %p1189_p1 = scmp.lt.s32.totalorder %s18_s13, %s18_s13 }
   0x4   :  { %p1185_p0 = scmp.ne.s32.totalorder %s18_s13, %s1184_s14  ;;  %p1190_p2 = scmp.lt.s32.totalorder %s1184_s14, %s1184_s14 }
   0x6   :  { %p1191_p3 = por %p1190_p2, %p1189_p1 }
   0x8   :  { %p1192_p4 = pnand %p1191_p3, %p1185_p0 }
   0xa   :  { %1195 = shalt.err (!%p1192_p4)
}
   0xb   :  { %s1221_s15 = smov 64   ;;  %s1222_s16 = smov 4  }
   0xc   :  { %23 = dma.hbm_to_vmem [thread:$0]  %s1318_s1, 3840, %s18_s13, [#allocation3], %s1221_s15, %s1221_s15, %s1222_s16  }
   0xd   :  { %1216 = dma.done.wait [#allocation3], 3840  }
   0xe   :  { %1217 = vsyncadd [#allocation3], 4294963456  ;;  %v1114_v0 = vld [vmem:[#allocation2 + $0x8] sm:$0xff]   ;;  %v1115_v1 = vld [vmem:[#allocation2] sm:$0xff]   ;;  %vm63_vm0 = vcmask 261120   ;;  %v47_v27 = vlaneseq }
   0xf   :  { %1000 = vmatprep.subr.bf16.mxu0 %v1114_v0  ;;  %v31_v2 = vld [vmem:[%s1317_s0] sm:$0xff]  ;;  %v32_v3 = vld [vmem:[%s1317_s0 + $0x8] sm:$0xff]  ;;  %v33_v5 = vld [vmem:[%s1317_s0 + $0x10] sm:$0xff] }
  0x10   :  { %1001 = vmatpush3.bf16.msra.mxu0 %v1114_v0  ;;  %v43_v4 = vpack.c.bf16 %v32_v3, %v31_v2  ;;  %v34_v6 = vld [vmem:[%s1317_s0 + $0x18] sm:$0xff]  ;;  %v35_v7 = vld [vmem:[%s1317_s0 + $0x20] sm:$0xff]  ;;  %v36_v8 = vld [vmem:[%s1317_s0 + $0x28] sm:$0xff]  ;;  %v1278_v28 = vshrl.u32 %v47_v27, 7 }
  0x11   :  { %1002 = vmatprep.subr.bf16.mxu0 %v1115_v1  ;;  %v1116_v9 = vld [vmem:[#allocation2 + $0x48] sm:$0xff]   ;;  %v44_v10 = vpack.c.bf16 %v34_v6, %v33_v5  ;;  %v1117_v11 = vld [vmem:[#allocation2 + $0x40] sm:$0xff]   ;;  %v45_v12 = vpack.c.bf16 %v36_v8, %v35_v7  ;;  %v37_v13 = vld [vmem:[%s1317_s0 + $0x30] sm:$0xff] }
  0x12   :  { %1004 = vmatprep.mubr.msk.bf16.mxu0 %vm63_vm0, %v43_v4  ;;  %1012 = vmatprep.subr.bf16.mxu1 %v1116_v9  ;;  %v38_v14 = vld [vmem:[%s1317_s0 + $0x38] sm:$0xff]  ;;  %v1119_v16 = vld [vmem:[#allocation2 + $0x30] sm:$0xff]   ;;  %v1120_v18 = vld [vmem:[#allocation2 + $0x28] sm:$0xff]   ;;  %v49_v29 = vsub.s32 0, %v1278_v28  ;;  %v171_v4 = vsub.s32 1, %v1278_v28 }
  0x13   :  { %1013 = vmatpush3.bf16.msra.mxu1 %v1116_v9  ;;  %v1118_v15 = vld [vmem:[#allocation2 + $0x38] sm:$0xff]   ;;  %v46_v17 = vpack.c.bf16 %v38_v14, %v37_v13  ;;  %v1121_v19 = vld [vmem:[#allocation2 + $0x20] sm:$0xff]   ;;  %v1123_v21 = vld [vmem:[#allocation2 + $0x10] sm:$0xff]  }
  0x14   :  { %1003 = vmatpush3.bf16.msra.mxu0 %v1115_v1  ;;  %1014 = vmatprep.subr.bf16.mxu1 %v1117_v11  ;;  %v1122_v20 = vld [vmem:[#allocation2 + $0x18] sm:$0xff]   ;;  %v1124_v22 = vld [vmem:[#allocation2 + $0x88] sm:$0xff]   ;;  %v1125_v23 = vld [vmem:[#allocation2 + $0x80] sm:$0xff]  }
  0x15   :  { %1036 = vmatprep.subr.bf16.mxu0 %v1124_v22  ;;  %v1126_v24 = vld [vmem:[#allocation2 + $0x78] sm:$0xff]   ;;  %v1127_v25 = vld [vmem:[#allocation2 + $0x70] sm:$0xff]   ;;  %v1128_v26 = vld [vmem:[#allocation2 + $0x68] sm:$0xff]  }
  0x16   :  { %v1284_v30 = vld [vmem:[%s1319_s2] sm:$0xff]  ;;  %v1130_v61 = vld [vmem:[#allocation2 + $0x58] sm:$0xff]   ;;  %v1131_v62 = vld [vmem:[#allocation2 + $0x50] sm:$0xff]   ;;  %s1223_s2 = smov [#allocation5]  }
  0x17   :  { %1005 = vmatmul.mubr.msk.bf16.vlgmr.msra.gmra.mxu0 %vm63_vm0, %v44_v10  ;;  %1015 = vmatpush3.bf16.msra.mxu1 %v1117_v11  ;;  %v50_v32 = vrot.slane %v1284_v30, %v49_v29  ;;  %v1129_v60 = vld [vmem:[#allocation2 + $0x60] sm:$0xff]   ;;  %v1132_v63 = vld [vmem:[#allocation2 + $0xc8] sm:$0xff]   ;;  %v1134_v1 = vld [vmem:[#allocation2 + $0xb8] sm:$0xff]   ;;  %v172_v6 = vrot.slane %v1284_v30, %v171_v4  ;;  %s892_s8 = sshll.u32 %s1223_s2, 4  ;;  %s893_s8 = int_to_ptr.vmem [resolvable:$true] %s892_s8 }
  0x18   :  { %1008 = vmatprep.mubr.msk.bf16.mxu0 %vm63_vm0, %v45_v12  ;;  %1016 = vmatprep.subr.bf16.mxu1 %v1118_v15  ;;  %v1133_v0 = vld [vmem:[#allocation2 + $0xc0] sm:$0xff]   ;;  %v1135_v2 = vld [vmem:[#allocation2 + $0xb0] sm:$0xff]   ;;  %v1136_v3 = vld [vmem:[#allocation2 + $0xa8] sm:$0xff]   ;;  %s1196_s9 = scalar_lea.vmem %s893_s8, 1024  ;;  %p1201_p6 = scmp.lt.s32.totalorder %s893_s8, %s893_s8 }
  0x19   :  { %1037 = vmatpush3.bf16.msra.mxu0 %v1124_v22  ;;  %p1197_p5 = scmp.ne.s32.totalorder %s893_s8, %s1196_s9  ;;  %p1202_p7 = scmp.lt.s32.totalorder %s1196_s9, %s1196_s9 }
  0x1a   :  { %1038 = vmatprep.subr.bf16.mxu0 %v1125_v23 }
  0x1b   :  { %1017 = vmatpush3.bf16.msra.mxu1 %v1118_v15  ;;  %p1203_p8 = por %p1202_p7, %p1201_p6 }
  0x1c   :  { %1018 = vmatprep.subr.bf16.mxu1 %v1119_v16 }
  0x1d   :  { %1039 = vmatpush3.bf16.msra.mxu0 %v1125_v23  ;;  %p1204_p9 = pnand %p1203_p8, %p1197_p5 }
  0x1e   :  { %1040 = vmatprep.subr.bf16.mxu0 %v1126_v24 }
  0x1f   :  { %1009 = vmatmul.mubr.msk.bf16.gmra.mxu0 %vm63_vm0, %v46_v17  ;;  %1019 = vmatpush3.bf16.msra.mxu1 %v1119_v16 }
  0x20   :  { %1020 = vmatprep.subr.bf16.mxu1 %v1120_v18 }
  0x21   :  { %1041 = vmatpush3.bf16.msra.mxu0 %v1126_v24 }
  0x22   :  { %1042 = vmatprep.subr.bf16.mxu0 %v1127_v25 }
  0x23   :  { %1021 = vmatpush3.bf16.msra.mxu1 %v1120_v18 }
  0x24   :  { %1022 = vmatprep.subr.bf16.mxu1 %v1121_v19 }
  0x25   :  { %1043 = vmatpush3.bf16.msra.mxu0 %v1127_v25 }
  0x26   :  { %1044 = vmatprep.subr.bf16.mxu0 %v1128_v26 }
  0x27   :  { %1023 = vmatpush3.bf16.msra.mxu1 %v1121_v19 }
  0x28   :  { %1024 = vmatprep.subr.bf16.mxu1 %v1122_v20 }
  0x29   :  { %1045 = vmatpush3.bf16.msra.mxu0 %v1128_v26 }
  0x2a   :  { %1046 = vmatprep.subr.bf16.mxu0 %v1129_v60 }
  0x2b   :  { %1025 = vmatpush3.bf16.msra.mxu1 %v1122_v20 }
  0x2c   :  { %1026 = vmatprep.subr.bf16.mxu1 %v1123_v21 }
  0x2d   :  { %1047 = vmatpush3.bf16.msra.mxu0 %v1129_v60 }
  0x2e   :  { %1048 = vmatprep.subr.bf16.mxu0 %v1130_v61 }
  0x2f   :  { %1027 = vmatpush3.bf16.msra.mxu1 %v1123_v21 }
  0x30   :  { %1060 = vmatprep.subr.bf16.mxu1 %v1132_v63 }
  0x31   :  { %1049 = vmatpush3.bf16.msra.mxu0 %v1130_v61 }
  0x32   :  { %1050 = vmatprep.subr.bf16.mxu0 %v1131_v62 }
  0x35   :  { %1051 = vmatpush3.bf16.msra.mxu0 %v1131_v62 }
  0xd7   :  { %v1006_v31 = vpop.f32.mrf.mxu0 }
  0xd8   :  { %v119_v37 = vadd.f32 %v1006_v31, %v50_v32 }
  0xd9   :  { %v110_v33 = vpop.f32.mrf.mxu0 }
  0xda   :  { %v111_v35 = vadd.f32 %v110_v33, %v50_v32  ;;  %v143_v44 = vmax.f32 %v119_v37, 0.0  ;;  %v1137_v37 = vld [vmem:[#allocation2 + $0xa0] sm:$0xff]  }
  0xdb   :  { %v1007_v34 = vpop.f32.mrf.mxu0 }
  0xdc   :  { %v122_v36 = vadd.f32 %v1007_v34, %v50_v32  ;;  %v141_v42 = vmax.f32 %v111_v35, 0.0 }
  0xdd   :  { %v113_v38 = vpop.f32.mrf.mxu0 }
  0xde   :  { %v114_v39 = vadd.f32 %v113_v38, %v50_v32  ;;  %v144_v40 = vmax.f32 %v122_v36, 0.0  ;;  %v1138_v38 = vld [vmem:[#allocation2 + $0x98] sm:$0xff]  }
  0xdf   :  { %v1010_v41 = vpop.f32.mrf.mxu0 }
  0xe0   :  { %v142_v43 = vmax.f32 %v114_v39, 0.0  ;;  %v166_v47 = vpack.c.bf16 %v144_v40, %v143_v44  ;;  %v135_v51 = vadd.f32 %v1010_v41, %v50_v32  ;;  %v1139_v39 = vld [vmem:[#allocation2 + $0x90] sm:$0xff]   ;;  %v1140_v40 = vld [vmem:[#allocation2 + $0xd8] sm:$0xff]   ;;  %v316_v41 = vsub.s32 2, %v1278_v28 }
  0xe1   :  { %v126_v45 = vpop.f32.mrf.mxu0  ;;  %1084 = vmatprep.subr.bf16.mxu0 %v1140_v40 }
  0xe2   :  { %v165_v46 = vpack.c.bf16 %v142_v43, %v141_v42  ;;  %v127_v49 = vadd.f32 %v126_v45, %v50_v32  ;;  %v147_v57 = vmax.f32 %v135_v51, 0.0  ;;  %v317_v43 = vrot.slane %v1284_v30, %v316_v41 }
  0xe3   :  { %v1011_v48 = vpop.f32.mrf.mxu0 }
  0xe4   :  { %v138_v50 = vadd.f32 %v1011_v48, %v50_v32  ;;  %1028 = vmatprep.mubr.bf16.mxu1 %v165_v46  ;;  %v145_v55 = vmax.f32 %v127_v49, 0.0 }
  0xe5   :  { %v129_v52 = vpop.f32.mrf.mxu0  ;;  %1029 = vmatmul.mubr.bf16.vlgmr.msra.gmra.mxu1 %v166_v47 }
  0xe6   :  { %v130_v53 = vadd.f32 %v129_v52, %v50_v32  ;;  %v148_v54 = vmax.f32 %v138_v50, 0.0  ;;  %1061 = vmatpush3.bf16.msra.mxu1 %v1132_v63 }
  0xe7   :  { %1062 = vmatprep.subr.bf16.mxu1 %v1133_v0 }
  0xe8   :  { %v146_v56 = vmax.f32 %v130_v53, 0.0  ;;  %v168_v59 = vpack.c.bf16 %v148_v54, %v147_v57 }
  0xea   :  { %v167_v58 = vpack.c.bf16 %v146_v56, %v145_v55  ;;  %1063 = vmatpush3.bf16.msra.mxu1 %v1133_v0 }
  0xeb   :  { %1064 = vmatprep.subr.bf16.mxu1 %v1134_v1 }
  0xec   :  { %1032 = vmatprep.mubr.bf16.mxu1 %v167_v58 }
  0xed   :  { %1033 = vmatmul.mubr.bf16.gmra.mxu1 %v168_v59 }
  0xee   :  { %1065 = vmatpush3.bf16.msra.mxu1 %v1134_v1 }
  0xef   :  { %1066 = vmatprep.subr.bf16.mxu1 %v1135_v2 }
  0xf2   :  { %1067 = vmatpush3.bf16.msra.mxu1 %v1135_v2 }
  0xf3   :  { %1068 = vmatprep.subr.bf16.mxu1 %v1136_v3 }
  0xf6   :  { %1069 = vmatpush3.bf16.msra.mxu1 %v1136_v3 }
  0xf7   :  { %1070 = vmatprep.subr.bf16.mxu1 %v1137_v37 }
  0xfa   :  { %1071 = vmatpush3.bf16.msra.mxu1 %v1137_v37 }
  0xfb   :  { %1072 = vmatprep.subr.bf16.mxu1 %v1138_v38 }
  0xfe   :  { %1073 = vmatpush3.bf16.msra.mxu1 %v1138_v38 }
  0xff   :  { %1074 = vmatprep.subr.bf16.mxu1 %v1139_v39 }
 0x102   :  { %1075 = vmatpush3.bf16.msra.mxu1 %v1139_v39 }
 0x1a5   :  { %v1030_v5 = vpop.f32.mrf.mxu1 }
 0x1a6   :  { %v264_v11 = vadd.f32 %v1030_v5, %v172_v6 }
 0x1a7   :  { %v255_v7 = vpop.f32.mrf.mxu1 }
 0x1a8   :  { %v256_v9 = vadd.f32 %v255_v7, %v172_v6  ;;  %v288_v18 = vmax.f32 %v264_v11, 0.0  ;;  %v1141_v7 = vld [vmem:[#allocation2 + $0xd0] sm:$0xff]  }
 0x1a9   :  { %v1031_v8 = vpop.f32.mrf.mxu1 }
 0x1aa   :  { %v267_v10 = vadd.f32 %v1031_v8, %v172_v6  ;;  %v286_v16 = vmax.f32 %v256_v9, 0.0  ;;  %v1142_v8 = vld [vmem:[#allocation2 + $0xe8] sm:$0xff]   ;;  %v461_v9 = vsub.s32 3, %v1278_v28 }
 0x1ab   :  { %v258_v12 = vpop.f32.mrf.mxu1 }
 0x1ac   :  { %v259_v13 = vadd.f32 %v258_v12, %v172_v6  ;;  %v289_v14 = vmax.f32 %v267_v10, 0.0  ;;  %v462_v11 = vrot.slane %v1284_v30, %v461_v9  ;;  %v703_v9 = vsub.s32 5, %v1278_v28 }
 0x1ad   :  { %v1034_v15 = vpop.f32.mrf.mxu1 }
 0x1ae   :  { %v287_v17 = vmax.f32 %v259_v13, 0.0  ;;  %v311_v21 = vpack.c.bf16 %v289_v14, %v288_v18  ;;  %v280_v25 = vadd.f32 %v1034_v15, %v172_v6 }
 0x1af   :  { %v271_v19 = vpop.f32.mrf.mxu1 }
 0x1b0   :  { %v310_v20 = vpack.c.bf16 %v287_v17, %v286_v16  ;;  %v272_v23 = vadd.f32 %v271_v19, %v172_v6  ;;  %v292_v34 = vmax.f32 %v280_v25, 0.0 }
 0x1b1   :  { %v1035_v22 = vpop.f32.mrf.mxu1 }
 0x1b2   :  { %v283_v24 = vadd.f32 %v1035_v22, %v172_v6  ;;  %1052 = vmatprep.mubr.bf16.mxu0 %v310_v20  ;;  %v290_v32 = vmax.f32 %v272_v23, 0.0 }
 0x1b3   :  { %v274_v26 = vpop.f32.mrf.mxu1  ;;  %1053 = vmatmul.mubr.bf16.vlgmr.msra.gmra.mxu0 %v311_v21 }
 0x1b4   :  { %v275_v29 = vadd.f32 %v274_v26, %v172_v6  ;;  %v293_v31 = vmax.f32 %v283_v24, 0.0  ;;  %1085 = vmatpush3.bf16.msra.mxu0 %v1140_v40 }
 0x1b5   :  { %1086 = vmatprep.subr.bf16.mxu0 %v1141_v7 }
 0x1b6   :  { %v291_v33 = vmax.f32 %v275_v29, 0.0  ;;  %v313_v36 = vpack.c.bf16 %v293_v31, %v292_v34 }
 0x1b8   :  { %v312_v35 = vpack.c.bf16 %v291_v33, %v290_v32  ;;  %1087 = vmatpush3.bf16.msra.mxu0 %v1141_v7 }
 0x1b9   :  { %1096 = vmatprep.subr.bf16.mxu0 %v1142_v8 }
 0x1ba   :  { %1056 = vmatprep.mubr.bf16.mxu0 %v312_v35 }
 0x1bb   :  { %1057 = vmatmul.mubr.bf16.gmra.mxu0 %v313_v36 }
 0x273   :  { %v1054_v42 = vpop.f32.mrf.mxu0 }
 0x274   :  { %v409_v48 = vadd.f32 %v1054_v42, %v317_v43  ;;  %v1143_v42 = vld [vmem:[#allocation2 + $0xe0] sm:$0xff]  }
 0x275   :  { %v400_v44 = vpop.f32.mrf.mxu0 }
 0x276   :  { %v401_v46 = vadd.f32 %v400_v44, %v317_v43  ;;  %v433_v55 = vmax.f32 %v409_v48, 0.0 }
 0x277   :  { %v1055_v45 = vpop.f32.mrf.mxu0 }
 0x278   :  { %v412_v47 = vadd.f32 %v1055_v45, %v317_v43  ;;  %v431_v53 = vmax.f32 %v401_v46, 0.0 }
 0x279   :  { %v403_v49 = vpop.f32.mrf.mxu0 }
 0x27a   :  { %v404_v50 = vadd.f32 %v403_v49, %v317_v43  ;;  %v434_v51 = vmax.f32 %v412_v47, 0.0 }
 0x27b   :  { %v1058_v52 = vpop.f32.mrf.mxu0 }
 0x27c   :  { %v432_v54 = vmax.f32 %v404_v50, 0.0  ;;  %v456_v58 = vpack.c.bf16 %v434_v51, %v433_v55  ;;  %v425_v62 = vadd.f32 %v1058_v52, %v317_v43 }
 0x27d   :  { %v416_v56 = vpop.f32.mrf.mxu0 }
 0x27e   :  { %v455_v57 = vpack.c.bf16 %v432_v54, %v431_v53  ;;  %v417_v60 = vadd.f32 %v416_v56, %v317_v43  ;;  %v437_v4 = vmax.f32 %v425_v62, 0.0 }
 0x27f   :  { %v1059_v59 = vpop.f32.mrf.mxu0 }
 0x280   :  { %v428_v61 = vadd.f32 %v1059_v59, %v317_v43  ;;  %1076 = vmatprep.mubr.bf16.mxu1 %v455_v57  ;;  %v435_v2 = vmax.f32 %v417_v60, 0.0 }
 0x281   :  { %v419_v63 = vpop.f32.mrf.mxu0  ;;  %1077 = vmatmul.mubr.bf16.vlgmr.msra.gmra.mxu1 %v456_v58 }
 0x282   :  { %v420_v0 = vadd.f32 %v419_v63, %v317_v43  ;;  %v438_v1 = vmax.f32 %v428_v61, 0.0  ;;  %v594_v43 = vsub.s32 4, %v1278_v28 }
 0x284   :  { %v436_v3 = vmax.f32 %v420_v0, 0.0  ;;  %v458_v6 = vpack.c.bf16 %v438_v1, %v437_v4  ;;  %v595_v45 = vrot.slane %v1284_v30, %v594_v43 }
 0x286   :  { %v457_v5 = vpack.c.bf16 %v436_v3, %v435_v2 }
 0x288   :  { %1080 = vmatprep.mubr.bf16.mxu1 %v457_v5 }
 0x289   :  { %1081 = vmatmul.mubr.bf16.gmra.mxu1 %v458_v6 }
 0x341   :  { %v1078_v10 = vpop.f32.mrf.mxu1 }
 0x342   :  { %v554_v16 = vadd.f32 %v1078_v10, %v462_v11  ;;  %v795_v10 = vand.u32 127, %v47_v27 }
 0x343   :  { %v545_v12 = vpop.f32.mrf.mxu1 }
 0x344   :  { %v546_v14 = vadd.f32 %v545_v12, %v462_v11  ;;  %v578_v23 = vmax.f32 %v554_v16, 0.0  ;;  %vm796_vm1 = vcmp.lt.s32.totalorder %v795_v10, 8 }
 0x345   :  { %v1079_v13 = vpop.f32.mrf.mxu1 }
 0x346   :  { %v557_v15 = vadd.f32 %v1079_v13, %v462_v11  ;;  %v576_v21 = vmax.f32 %v546_v14, 0.0 }
 0x347   :  { %v548_v17 = vpop.f32.mrf.mxu1 }
 0x348   :  { %v549_v18 = vadd.f32 %v548_v17, %v462_v11  ;;  %v579_v19 = vmax.f32 %v557_v15, 0.0 }
 0x349   :  { %v1082_v20 = vpop.f32.mrf.mxu1 }
 0x34a   :  { %v577_v22 = vmax.f32 %v549_v18, 0.0  ;;  %v589_v26 = vpack.c.bf16 %v579_v19, %v578_v23  ;;  %v570_v33 = vadd.f32 %v1082_v20, %v462_v11 }
 0x34b   :  { %v561_v24 = vpop.f32.mrf.mxu1 }
 0x34c   :  { %v588_v25 = vpack.c.bf16 %v577_v22, %v576_v21  ;;  %v562_v31 = vadd.f32 %v561_v24, %v462_v11  ;;  %v582_v39 = vmax.f32 %v570_v33, 0.0 }
 0x34d   :  { %v1083_v29 = vpop.f32.mrf.mxu1 }
 0x34e   :  { %v573_v32 = vadd.f32 %v1083_v29, %v462_v11  ;;  %1088 = vmatprep.mubr.msk.bf16.mxu0 %vm63_vm0, %v588_v25  ;;  %v580_v37 = vmax.f32 %v562_v31, 0.0 }
 0x34f   :  { %v564_v34 = vpop.f32.mrf.mxu1  ;;  %1089 = vmatmul.mubr.msk.bf16.vlgmr.msra.gmra.mxu0 %vm63_vm0, %v589_v26 }
 0x350   :  { %v565_v35 = vadd.f32 %v564_v34, %v462_v11  ;;  %1097 = vmatpush3.bf16.msra.mxu0 %v1142_v8  ;;  %v583_v36 = vmax.f32 %v573_v32, 0.0  ;;  %v704_v11 = vrot.slane %v1284_v30, %v703_v9 }
 0x351   :  { %1098 = vmatprep.subr.bf16.mxu0 %v1143_v42 }
 0x352   :  { %v581_v38 = vmax.f32 %v565_v35, 0.0  ;;  %v591_v41 = vpack.c.bf16 %v583_v36, %v582_v39 }
 0x354   :  { %v590_v40 = vpack.c.bf16 %v581_v38, %v580_v37  ;;  %1099 = vmatpush3.bf16.msra.mxu0 %v1143_v42 }
 0x356   :  { %1092 = vmatprep.mubr.msk.bf16.mxu0 %vm63_vm0, %v590_v40 }
 0x357   :  { %1093 = vmatmul.mubr.msk.bf16.gmra.mxu0 %vm63_vm0, %v591_v41 }
 0x40f   :  { %v1090_v44 = vpop.f32.mrf.mxu0 }
 0x410   :  { %v663_v50 = vadd.f32 %v1090_v44, %v595_v45 }
 0x411   :  { %v654_v46 = vpop.f32.mrf.mxu0 }
 0x412   :  { %v655_v48 = vadd.f32 %v654_v46, %v595_v45  ;;  %v687_v57 = vmax.f32 %v663_v50, 0.0 }
 0x413   :  { %v1091_v47 = vpop.f32.mrf.mxu0 }
 0x414   :  { %v666_v49 = vadd.f32 %v1091_v47, %v595_v45  ;;  %v685_v55 = vmax.f32 %v655_v48, 0.0 }
 0x415   :  { %v657_v51 = vpop.f32.mrf.mxu0 }
 0x416   :  { %v658_v52 = vadd.f32 %v657_v51, %v595_v45  ;;  %v688_v53 = vmax.f32 %v666_v49, 0.0 }
 0x417   :  { %v1094_v54 = vpop.f32.mrf.mxu0 }
 0x418   :  { %v686_v56 = vmax.f32 %v658_v52, 0.0  ;;  %v698_v60 = vpack.c.bf16 %v688_v53, %v687_v57  ;;  %v679_v0 = vadd.f32 %v1094_v54, %v595_v45 }
 0x419   :  { %v670_v58 = vpop.f32.mrf.mxu0 }
 0x41a   :  { %v697_v59 = vpack.c.bf16 %v686_v56, %v685_v55  ;;  %v671_v62 = vadd.f32 %v670_v58, %v595_v45  ;;  %v691_v6 = vmax.f32 %v679_v0, 0.0 }
 0x41b   :  { %v1095_v61 = vpop.f32.mrf.mxu0 }
 0x41c   :  { %v682_v63 = vadd.f32 %v1095_v61, %v595_v45  ;;  %1100 = vmatprep.mubr.msk.bf16.mxu0 %vm63_vm0, %v697_v59  ;;  %v689_v4 = vmax.f32 %v671_v62, 0.0 }
 0x41d   :  { %v673_v1 = vpop.f32.mrf.mxu0  ;;  %1101 = vmatmul.mubr.msk.bf16.vlgmr.msra.gmra.mxu0 %vm63_vm0, %v698_v60 }
 0x41e   :  { %v674_v2 = vadd.f32 %v673_v1, %v595_v45  ;;  %v692_v3 = vmax.f32 %v682_v63, 0.0 }
 0x420   :  { %v690_v5 = vmax.f32 %v674_v2, 0.0  ;;  %v700_v8 = vpack.c.bf16 %v692_v3, %v691_v6 }
 0x422   :  { %v699_v7 = vpack.c.bf16 %v690_v5, %v689_v4 }
 0x424   :  { %1104 = vmatprep.mubr.msk.bf16.mxu0 %vm63_vm0, %v699_v7 }
 0x425   :  { %1105 = vmatmul.mubr.msk.bf16.gmra.mxu0 %vm63_vm0, %v700_v8 }
 0x4dd   :  { %v1102_v12 = vpop.f32.mrf.mxu0 }
 0x4de   :  { %v772_v13 = vadd.f32 %v1102_v12, %v704_v11 }
 0x4df   :  { %v763_v14 = vpop.f32.mrf.mxu0 }
 0x4e0   :  { %v764_v15 = vadd.f32 %v763_v14, %v704_v11  ;;  %v801_v16 = vsel %vm796_vm1, %v772_v13, -1e+30 }
 0x4e1   :  { %811 = vmax.xlane.f32.xlu1 %v801_v16  ;;  %v1103_v17 = vpop.f32.mrf.mxu0 }
 0x4e2   :  { %v775_v18 = vadd.f32 %v1103_v17, %v704_v11  ;;  %v799_v19 = vsel %vm796_vm1, %v764_v15, -1e+30 }
 0x4e3   :  { %v766_v20 = vpop.f32.mrf.mxu0  ;;  %807 = vmax.xlane.f32.xlu0 %v799_v19 }
 0x4e4   :  { %v767_v21 = vadd.f32 %v766_v20, %v704_v11  ;;  %v802_v28 = vsel %vm796_vm1, %v775_v18, -1e+30 }
 0x4e5   :  { %813 = vmax.xlane.f32.xlu1 %v802_v28  ;;  %v1106_v27 = vpop.f32.mrf.mxu0 }
 0x4e6   :  { %v800_v30 = vsel %vm796_vm1, %v767_v21, -1e+30  ;;  %v788_v25 = vadd.f32 %v1106_v27, %v704_v11 }
 0x4e7   :  { %v779_v22 = vpop.f32.mrf.mxu0  ;;  %809 = vmax.xlane.f32.xlu0 %v800_v30 }
 0x4e8   :  { %v780_v23 = vadd.f32 %v779_v22, %v704_v11  ;;  %v805_v34 = vsel %vm796_vm1, %v788_v25, -1e+30 }
 0x4e9   :  { %v1107_v24 = vpop.f32.mrf.mxu0 }
 0x4ea   :  { %v803_v26 = vsel %vm796_vm1, %v780_v23, -1e+30  ;;  %v791_v32 = vadd.f32 %v1107_v24, %v704_v11 }
 0x4eb   :  { %v782_v29 = vpop.f32.mrf.mxu0  ;;  %815 = vmax.xlane.f32.xlu0 %v803_v26 }
 0x4ec   :  { %v783_v31 = vadd.f32 %v782_v29, %v704_v11  ;;  %v806_v35 = vsel %vm796_vm1, %v791_v32, -1e+30 }
 0x4ee   :  { %v804_v33 = vsel %vm796_vm1, %v783_v31, -1e+30 }
 0x4ef   :  { %817 = vmax.xlane.f32.xlu1 %v804_v33  ;;  %819 = vmax.xlane.f32.xlu0 %v805_v34 }
 0x4f3   :  { %821 = vmax.xlane.f32.xlu1 %v806_v35 }
 0x56a   :  { %v812_v36 = vpop.xlane.xlu1 %811 }
 0x56b   :  { %v825_v37 = vsub.f32 %v801_v16, %v812_v36 }
 0x56c   :  { %v808_v38 = vpop.xlane.xlu0 %807 }
 0x56d   :  { %v835_v39 = vmul.f32 1.442695, %v825_v37  ;;  %v823_v40 = vsub.f32 %v799_v19, %v808_v38 }
 0x56e   :  { %v814_v41 = vpop.xlane.xlu1 %813 }
 0x56f   :  { %1144 = vpow2.f32 %v835_v39  ;;  %v831_v42 = vmul.f32 1.442695, %v823_v40  ;;  %v826_v43 = vsub.f32 %v802_v28, %v814_v41 }
 0x570   :  { %v810_v44 = vpop.xlane.xlu0 %809 }
 0x571   :  { %v837_v45 = vmul.f32 1.442695, %v826_v43  ;;  %v824_v46 = vsub.f32 %v800_v30, %v810_v44  ;;  %1146 = vpow2.f32 %v831_v42 }
 0x573   :  { %1148 = vpow2.f32 %v837_v45  ;;  %v833_v47 = vmul.f32 1.442695, %v824_v46 }
 0x574   :  { %v816_v48 = vpop.xlane.xlu0 %815 }
 0x575   :  { %v827_v49 = vsub.f32 %v803_v26, %v816_v48  ;;  %1150 = vpow2.f32 %v833_v47 }
 0x577   :  { %v839_v50 = vmul.f32 1.442695, %v827_v49 }
 0x578   :  { %v818_v51 = vpop.xlane.xlu1 %817  ;;  %v820_v52 = vpop.xlane.xlu0 %819 }
 0x579   :  { %1152 = vpow2.f32 %v839_v50  ;;  %v828_v53 = vsub.f32 %v804_v33, %v818_v51  ;;  %v829_v54 = vsub.f32 %v805_v34, %v820_v52 }
 0x57b   :  { %v841_v55 = vmul.f32 1.442695, %v828_v53  ;;  %v843_v56 = vmul.f32 1.442695, %v829_v54 }
 0x57c   :  { %v1145_v57 = vpop.eup %1144  ;;  %v822_v58 = vpop.xlane.xlu1 %821 }
 0x57d   :  { %1154 = vpow2.f32 %v841_v55  ;;  %v830_v59 = vsub.f32 %v806_v35, %v822_v58  ;;  %851 = vadd.xlane.f32.xlu0 %v1145_v57 }
 0x57e   :  { %1156 = vpow2.f32 %v843_v56  ;;  %v1147_v60 = vpop.eup %1146 }
 0x57f   :  { %v845_v61 = vmul.f32 1.442695, %v830_v59 }
 0x580   :  { %v1149_v62 = vpop.eup %1148 }
 0x581   :  { %1158 = vpow2.f32 %v845_v61  ;;  %853 = vadd.xlane.f32.xlu1 %v1149_v62  ;;  %847 = vadd.xlane.f32.xlu0 %v1147_v60 }
 0x582   :  { %v1151_v63 = vpop.eup %1150 }
 0x585   :  { %849 = vadd.xlane.f32.xlu1 %v1151_v63 }
 0x586   :  { %v1153_v0 = vpop.eup %1152 }
 0x587   :  { %855 = vadd.xlane.f32.xlu0 %v1153_v0 }
 0x58a   :  { %v1155_v1 = vpop.eup %1154 }
 0x58b   :  { %v1157_v2 = vpop.eup %1156  ;;  %857 = vadd.xlane.f32.xlu1 %v1155_v1 }
 0x58c   :  { %859 = vadd.xlane.f32.xlu0 %v1157_v2 }
 0x58e   :  { %v1159_v3 = vpop.eup %1158 }
 0x58f   :  { %861 = vadd.xlane.f32.xlu1 %v1159_v3 }
 0x606   :  { %v852_v4 = vpop.xlane.xlu0 %851 }
 0x607   :  { %1160 = vrcp.f32 %v852_v4 }
 0x60a   :  { %v854_v5 = vpop.xlane.xlu1 %853  ;;  %v848_v6 = vpop.xlane.xlu0 %847 }
 0x60b   :  { %1162 = vrcp.f32 %v854_v5 }
 0x60c   :  { %1164 = vrcp.f32 %v848_v6 }
 0x60e   :  { %v850_v7 = vpop.xlane.xlu1 %849 }
 0x60f   :  { %1166 = vrcp.f32 %v850_v7 }
 0x610   :  { %v856_v8 = vpop.xlane.xlu0 %855 }
 0x611   :  { %1168 = vrcp.f32 %v856_v8 }
 0x614   :  { %v1161_v9 = vpop.eup %1160  ;;  %v858_v10 = vpop.xlane.xlu1 %857 }
 0x615   :  { %v873_v11 = vmul.f32 %v1161_v9, %v1145_v57  ;;  %1170 = vrcp.f32 %v858_v10  ;;  %v860_v12 = vpop.xlane.xlu0 %859 }
 0x616   :  { %1172 = vrcp.f32 %v860_v12 }
 0x617   :  { %881 = vst [vmem:[#allocation5 + $0x10] sm:$0xff] %v873_v11 }
 0x618   :  { %v1163_v13 = vpop.eup %1162  ;;  %v862_v14 = vpop.xlane.xlu1 %861 }
 0x619   :  { %v1165_v15 = vpop.eup %1164  ;;  %v874_v16 = vmul.f32 %v1163_v13, %v1149_v62  ;;  %1174 = vrcp.f32 %v862_v14 }
 0x61a   :  { %v871_v17 = vmul.f32 %v1165_v15, %v1147_v60 }
 0x61b   :  { %882 = vst [vmem:[#allocation5 + $0x18] sm:$0xff] %v874_v16 }
 0x61c   :  { %v1167_v18 = vpop.eup %1166  ;;  %879 = vst [vmem:[#allocation5] sm:$0xff] %v871_v17 }
 0x61d   :  { %v872_v19 = vmul.f32 %v1167_v18, %v1151_v63 }
 0x61e   :  { %v1169_v20 = vpop.eup %1168 }
 0x61f   :  { %880 = vst [vmem:[#allocation5 + $0x8] sm:$0xff] %v872_v19  ;;  %v875_v21 = vmul.f32 %v1169_v20, %v1153_v0 }
 0x621   :  { %883 = vst [vmem:[#allocation5 + $0x20] sm:$0xff] %v875_v21 }
 0x622   :  { %v1171_v28 = vpop.eup %1170 }
 0x623   :  { %v1173_v27 = vpop.eup %1172  ;;  %v876_v30 = vmul.f32 %v1171_v28, %v1155_v1 }
 0x624   :  { %v877_v22 = vmul.f32 %v1173_v27, %v1157_v2 }
 0x625   :  { %884 = vst [vmem:[#allocation5 + $0x28] sm:$0xff] %v876_v30 }
 0x626   :  { %v1175_v23 = vpop.eup %1174  ;;  %885 = vst [vmem:[#allocation5 + $0x30] sm:$0xff] %v877_v22 }
 0x627   :  { %v878_v24 = vmul.f32 %v1175_v23, %v1159_v3 }
 0x629   :  { %886 = vst [vmem:[#allocation5 + $0x38] sm:$0xff] %v878_v24 }
 0x62a   :  { %1207 = shalt.err (!%p1204_p9)
}
 0x62b   :  { %s1224_s10 = smov 128   ;;  %s1225_s11 = smov 8  }
 0x62c   :  { %898 = dma.vmem_to_hbm [thread:$0]  %s893_s8, 1024, %s1320_s3, [#allocation4], %s1224_s10, %s1224_s10, %s1225_s11  }
 0x62d   :  { %1218 = dma.done.wait [#allocation4], 1024  }
 0x62e   :  { %1219 = vsyncadd [#allocation4], 4294966272 }
 0x62f   :  { %902 = vsyncpa [#allocation3], 1 }
 0x630   :  { %903 = vsyncpa [#allocation4], 1 }

</bundles_post_ra>
